<compile_context>
chip_gen: v7x
topology: tpu7x:2x2x1
jax: 0.10.0
libtpu: 0.0.40
codegen_flags: <defaults>
</compile_context>

<pallas_src>
import jax
import jax.numpy as jnp
import numpy as np
from jax.experimental import pallas as pl
from jax.experimental.pallas import tpu as pltpu


def _grid_sample_kernel(wy_ref, xh_ref, bdwx_ref, o_ref):
    """Separable bilinear resample for a block of B batch elements.

    wy_ref  : (B, T, H)      row-interpolation weights
    xh_ref  : (B, H, C*W)    input images, channels folded into the lane dim
    bdwx_ref: (B, C*W, C*T)  block-diagonal column-interpolation weights
    o_ref   : (B, T, C*T)    output slab; o[b, i, c*T + j] = out[b, c, i, j]
    """
    # s2[b, h, c*T+j] = sum_w x[b,c,h,w] * wx[b,j,w]
    # (block-diagonal weight folds the channel dim into the contraction;
    #  the zero blocks are free MACs on an otherwise idle MXU)
    s2 = jax.lax.dot_general(
        xh_ref[...], bdwx_ref[...],
        dimension_numbers=(((2,), (1,)), ((0,), (0,))),
        preferred_element_type=jnp.float32)
    s2 = s2.astype(wy_ref.dtype)
    # out[b, i, c*T+j] = sum_h wy[b,i,h] * s2[b,h,c*T+j]
    out = jax.lax.dot_general(
        wy_ref[...], s2,
        dimension_numbers=(((2,), (1,)), ((0,), (0,))),
        preferred_element_type=jnp.float32)
    # One cast + one store for the whole block.
    o_ref[...] = out.astype(o_ref.dtype)


def _coord_to_weights(coord, size):
    """coord: (N, T) normalized coords in grid_sample convention.

    Returns dense bilinear weights (N, T, size) for align_corners=True with
    padding_mode='zeros' (out-of-range corners get zero weight, no
    renormalization) -- matching F.grid_sample defaults.  Corner selection is
    done with int32 comparisons (robust, no float-equality).
    """
    px = (coord + 1.0) * 0.5 * (size - 1)            # pixel-space coordinate
    p0f = jnp.floor(px)
    w1 = px - p0f                                    # weight of ceil corner
    w0 = 1.0 - w1                                    # weight of floor corner
    p0 = p0f.astype(jnp.int32)[..., None]            # (N, T, 1)
    idx = jnp.arange(size, dtype=jnp.int32)[None, None, :]
    m0 = (idx == p0).astype(coord.dtype)             # floor corner (0 if OOB)
    m1 = (idx == (p0 + 1)).astype(coord.dtype)       # ceil corner  (0 if OOB)
    return w0[..., None] * m0 + w1[..., None] * m1


def _padded_bytes(shape, itemsize):
    """VMEM footprint of a 2-D tile after (8, 128) layout padding."""
    dims = list(shape)
    dims[-1] = -(-dims[-1] // 128) * 128
    if len(dims) >= 2:
        dims[-2] = -(-dims[-2] // 8) * 8
    n = 1
    for d in dims:
        n *= d
    return n * itemsize


def _vmem_budget():
    """(vmem_limit_bytes, block_budget_bytes), generation-aware.

    v7x has 64 MiB VMEM per TensorCore vs 128 MiB on v5e/v6e; size against the
    queried capacity with a conservative fallback so the same code compiles on
    every generation.
    """
    phys = 64 << 20
    try:
        phys = pltpu.get_tpu_info().vmem_capacity_bytes
    except Exception:
        pass
    limit = min(phys // 2, 32 << 20)     # scoped VMEM limit we request
    budget = (limit * 3) // 4            # double-buffered block budget
    return limit, budget


def _pick_batch_block(N, per_batch_bytes, budget_bytes, cap=32):
    """Largest divisor of N (<= cap) whose double-buffered block fits budget.

    Prefers keeping G = N // B even (costing at most a factor of 2 in B) so
    the 'parallel' grid axis can be split across v7x's two TensorCores.
    """
    fit = max(1, budget_bytes // max(1, 2 * per_batch_bytes))  # x2 double-buffer
    cap = int(max(1, min(cap, N, fit)))
    divisors = [b for b in range(1, N + 1) if N % b == 0 and b <= cap]
    best = max(divisors)
    even_g = [b for b in divisors if (N // b) % 2 == 0 and 2 * b >= best]
    return max(even_g) if even_g else best


class RandomTransform:
    """JAX/Pallas port of the PyTorch RandomTransform (bilinear, align=True)."""

    def __init__(self, source_size, target_size, shift=8, fliplr=True,
                 flipud=False, mode='bilinear', align=True):
        assert mode == 'bilinear' and align, "only bilinear + align_corners=True"
        k = float(target_size) / float(source_size)
        # grid[0, i, j, 0] = lin[j]  (x, varies with output column)
        # grid[0, i, j, 1] = lin[i]  (y, varies with output row)
        self.lin = jnp.linspace(-1.0, k, target_size, dtype=jnp.float32)
        self.delta = jnp.linspace(0.0, 1.0, source_size,
                                  dtype=jnp.float32)[shift]
        self.fliplr = fliplr
        self.flipud = flipud
        self.target_size = target_size

    def weights(self, x, randgen):
        """Build per-batch separable interpolation weights (Wy, Wx)."""
        _, _, H, W = x.shape
        x_shift = (randgen[:, 0] - 0.5) * 2.0 * self.delta      # (N,)
        y_shift = (randgen[:, 1] - 0.5) * 2.0 * self.delta      # (N,)
        gx = self.lin[None, :] + x_shift[:, None]               # (N, T)
        gy = self.lin[None, :] + y_shift[:, None]               # (N, T)
        if self.fliplr:
            sgn = jnp.where(randgen[:, 2] > 0.5, -1.0, 1.0)
            gx = gx * sgn[:, None]
        if self.flipud:
            sgn = jnp.where(randgen[:, 3] > 0.5, -1.0, 1.0)
            gy = gy * sgn[:, None]
        wx = _coord_to_weights(gx, W)    # (N, T, W)
        wy = _coord_to_weights(gy, H)    # (N, T, H)
        return wy, wx

    def __call__(self, x, randgen):
        # TODO(synk): randgen=None -> torch.rand(N, 4) fallback has no stateless
        # JAX equivalent; pass randgen explicitly (determinism).
        N, C, H, W = x.shape
        T = self.target_size
        wy, wx = self.weights(x, randgen)
        # TODO(synk): weights are cast to x.dtype; for bf16 inputs keep f32
        # weights if bit-closeness to torch's f32 grid_sample matters.
        wy = wy.astype(x.dtype)
        wx = wx.astype(x.dtype)

        # --- plain-JAX glue: lane-dense input + block-diagonal Wx -----------
        # x_h[n, h, c*W + w] = x[n, c, h, w]
        x_h = x.transpose(0, 2, 1, 3).reshape(N, H, C * W)
        # bdwx[n, c*W + w, d*T + j] = (c == d) * wx[n, j, w]
        eye = jnp.eye(C, dtype=wx.dtype)
        bdwx = jnp.einsum('cd,njw->ncwdj', eye, wx).reshape(N, C * W, C * T)

        itemsize = np.dtype(x.dtype).itemsize
        per_batch = (_padded_bytes((H, C * W), itemsize)
                     + _padded_bytes((C * W, C * T), itemsize)
                     + _padded_bytes((T, H), itemsize)
                     + _padded_bytes((T, C * T), itemsize))
        vmem_limit, budget = _vmem_budget()
        B = _pick_batch_block(N, per_batch, budget)
        G = N // B

        out_slab = pl.pallas_call(
            _grid_sample_kernel,
            out_shape=jax.ShapeDtypeStruct((N, T, C * T), x.dtype),
            grid=(G,),
            in_specs=[
                pl.BlockSpec((B, T, H), lambda g: (g, 0, 0)),
                pl.BlockSpec((B, H, C * W), lambda g: (g, 0, 0)),
                pl.BlockSpec((B, C * W, C * T), lambda g: (g, 0, 0)),
            ],
            out_specs=pl.BlockSpec((B, T, C * T), lambda g: (g, 0, 0)),
            compiler_params=pltpu.CompilerParams(
                dimension_semantics=("parallel",),
                vmem_limit_bytes=vmem_limit),
        )(wy, x_h, bdwx)

        # Layout plumbing (outside the kernel): (N, T, C*T) -> (N, C, T, T).
        return out_slab.reshape(N, T, C, T).transpose(0, 2, 1, 3)


if __name__ == "__main__":
    key = jax.random.PRNGKey(0)
    k_x, k_r, k_x2, k_r2 = jax.random.split(key, 4)

    # Primary config (small shapes, module defaults-ish).
    N, C, S, T = 2, 4, 16, 16            # batch, channels, source, target
    x = jax.random.normal(k_x, (N, C, S, S), dtype=jnp.float32)
    randgen = jax.random.uniform(k_r, (N, 4), dtype=jnp.float32)

    rt = RandomTransform(source_size=S, target_size=T, shift=4,
                         fliplr=True, flipud=False)
    out = jax.block_until_ready(rt(x, randgen))
    assert out.shape == (N, C, T, T)

    # plain-JAX reference for the hot path (same separable weights)
    wy, wx = rt.weights(x, randgen)
    ref = jnp.einsum('nih,nchw,njw->ncij', wy, x, wx)
    np.testing.assert_allclose(np.asarray(out), np.asarray(ref),
                               rtol=1e-5, atol=1e-5)

    # Second config: larger batch (exercises B > 1 batched dots, even-G
    # block picking) and both flip branches.
    N2 = 8
    x2 = jax.random.normal(k_x2, (N2, C, S, S), dtype=jnp.float32)
    randgen2 = jax.random.uniform(k_r2, (N2, 4), dtype=jnp.float32)
    rt2 = RandomTransform(source_size=S, target_size=T, shift=4,
                          fliplr=True, flipud=True)
    out2 = jax.block_until_ready(rt2(x2, randgen2))
    assert out2.shape == (N2, C, T, T)
    wy2, wx2 = rt2.weights(x2, randgen2)
    ref2 = jnp.einsum('nih,nchw,njw->ncij', wy2, x2, wx2)
    np.testing.assert_allclose(np.asarray(out2), np.asarray(ref2),
                               rtol=1e-5, atol=1e-5)

    print("KERNEL_OK")
</pallas_src>

<mosaic_0001>
module attributes {stable_mosaic.version = 11 : i64} {
  func.func @_grid_sample_kernel(%arg0: i32, %arg1: memref<1x16x16xf32, #tpu.memory_space<vmem>>, %arg2: memref<1x16x64xf32, #tpu.memory_space<vmem>>, %arg3: memref<1x64x64xf32, #tpu.memory_space<vmem>>, %arg4: memref<1x16x64xf32, #tpu.memory_space<vmem>>) attributes {dimension_semantics = [#tpu.dimension_semantics<parallel>], iteration_bounds = array<i64: 2>, scalar_prefetch = 0 : i64, scratch_operands = 0 : i64, tpu.core_type = #tpu.core_type<tc>, window_params = [{transform_indices = @transform_0, window_bounds = array<i64: 1, 16, 16>}, {transform_indices = @transform_1, window_bounds = array<i64: 1, 16, 64>}, {transform_indices = @transform_2, window_bounds = array<i64: 1, 64, 64>}, {transform_indices = @transform_3, window_bounds = array<i64: 1, 16, 64>}]} {
    %c0 = arith.constant 0 : index
    %c0_0 = arith.constant 0 : index
    %c0_1 = arith.constant 0 : index
    %0 = vector.load %arg2[%c0, %c0_0, %c0_1] : memref<1x16x64xf32, #tpu.memory_space<vmem>>, vector<1x16x64xf32>
    %c0_2 = arith.constant 0 : index
    %c0_3 = arith.constant 0 : index
    %c0_4 = arith.constant 0 : index
    %1 = vector.load %arg3[%c0_2, %c0_3, %c0_4] : memref<1x64x64xf32, #tpu.memory_space<vmem>>, vector<1x64x64xf32>
    %cst = arith.constant dense<0.000000e+00> : vector<1x16x64xf32>
    %2 = tpu.matmul %0, %1, %cst {dimension_numbers = #tpu.dot_dimension_numbers<[2], [1], [1], [2], [0, 0, 0, 1, 1, 2], [0], [0]>} : vector<1x16x64xf32>, vector<1x64x64xf32>, vector<1x16x64xf32> -> vector<1x16x64xf32>
    %c0_5 = arith.constant 0 : index
    %c0_6 = arith.constant 0 : index
    %c0_7 = arith.constant 0 : index
    %3 = vector.load %arg1[%c0_5, %c0_6, %c0_7] : memref<1x16x16xf32, #tpu.memory_space<vmem>>, vector<1x16x16xf32>
    %cst_8 = arith.constant dense<0.000000e+00> : vector<1x16x64xf32>
    %4 = tpu.matmul %3, %2, %cst_8 {dimension_numbers = #tpu.dot_dimension_numbers<[2], [1], [1], [2], [0, 0, 0, 1, 1, 2], [0], [0]>} : vector<1x16x16xf32>, vector<1x16x64xf32>, vector<1x16x64xf32> -> vector<1x16x64xf32>
    %c0_9 = arith.constant 0 : index
    %c0_10 = arith.constant 0 : index
    %c0_11 = arith.constant 0 : index
    %5 = vector.load %arg4[%c0_9, %c0_10, %c0_11] : memref<1x16x64xf32, #tpu.memory_space<vmem>>, vector<1x16x64xf32>
    tpu.vector_store %arg4[%c0_9, %c0_10, %c0_11], %4 {strides = array<i32>} : memref<1x16x64xf32, #tpu.memory_space<vmem>>, vector<1x16x64xf32>,
    return
  }
  func.func @transform_0(%arg0: i32) -> (i32, i32, i32) {
    %c0_i32 = arith.constant 0 : i32
    %c0_i32_0 = arith.constant 0 : i32
    %c0_i32_1 = arith.constant 0 : i32
    return %arg0, %c0_i32, %c0_i32_0 : i32, i32, i32
  }
  func.func @transform_1(%arg0: i32) -> (i32, i32, i32) {
    %c0_i32 = arith.constant 0 : i32
    %c0_i32_0 = arith.constant 0 : i32
    %c0_i32_1 = arith.constant 0 : i32
    return %arg0, %c0_i32, %c0_i32_0 : i32, i32, i32
  }
  func.func @transform_2(%arg0: i32) -> (i32, i32, i32) {
    %c0_i32 = arith.constant 0 : i32
    %c0_i32_0 = arith.constant 0 : i32
    %c0_i32_1 = arith.constant 0 : i32
    return %arg0, %c0_i32, %c0_i32_0 : i32, i32, i32
  }
  func.func @transform_3(%arg0: i32) -> (i32, i32, i32) {
    %c0_i32 = arith.constant 0 : i32
    %c0_i32_0 = arith.constant 0 : i32
    %c0_i32_1 = arith.constant 0 : i32
    return %arg0, %c0_i32, %c0_i32_0 : i32, i32, i32
  }
}

</mosaic_0001>

<bundles_post_ra>
// kernel: tpu_custom_call.1
= control target key start
LH: loop header
LB: loop body
LE: loop exit
PB: predicated region body
PF: predicated region fallthrough
CT: control target
= control target key end

     0   :  { %s1184_s0 = inlined_call_operand.hbm [shape: f32[2,16,16], index: 0, kind: input, shape index: {}]   ;;  %s1185_s1 = inlined_call_operand.hbm [shape: f32[2,16,64], index: 1, kind: input, shape index: {}]   ;;  %s1186_s2 = inlined_call_operand.hbm [shape: f32[2,64,64], index: 2, kind: input, shape index: {}]   ;;  %s1187_s3 = inlined_call_operand.hbm [shape: f32[2,16,64], index: 3, kind: output, shape index: {}]  }
   0x1   :  { %1194 = sst [smem:[#allocation12_spill]] %s1184_s0 }
   0x2   :  { %8 = vsyncpa [#allocation3], 0 }
   0x3   :  { %10 = vsyncpa [#allocation3 + $0x1], 0 }
   0x4   :  { %11 = vsyncpa [#allocation6], 0 }
   0x5   :  { %13 = vsyncpa [#allocation6 + $0x1], 0 }
   0x6   :  { %14 = vsyncpa [#allocation4], 0 }
   0x7   :  { %16 = vsyncpa [#allocation4 + $0x1], 0  ;;  %s914_s12 = smov 0   ;;  %s916_s13 = smov 0  }
   0x8   :  { %s918_s14 = smov 0   ;;  %s920_s15 = smov 0  }
   0x9 LB: > { %s935_s16 = sadd.s32 4294967295, %s884_s15   ;;  %s574_s17 = sadd.s32 4294967294, %s884_s15   ;;  %s884_s15 = sphi %s920_s15, %s1213_s15   ;;  %s880_s14 = sphi %s918_s14, %s1212_s14   ;;  %s876_s13 = sphi %s916_s13, %s1211_s13   ;;  %s872_s12 = sphi %s914_s12, %s1210_s12  }
   0xa   : > { %s939_s18 = sadd.s32 1, %s884_s15   ;;  %s29_s19 = sadd.s32 1, %s880_s14 }
   0xb   : > { %s26_s20 = ssub.s32 %s884_s15, %s939_s18  ;;  %p36_p0 = scmp.ne.s32.totalorder %s880_s14, %s876_s13 }
   0xc   : > { %p27_p1 = scmp.eq.s32.totalorder %s26_s20, 0  ;;  %p37_p2 = scmp.eq.s32.totalorder %s884_s15, 0 }
   0xd   : > { %p42_p3 = scmp.ne.s32.totalorder %s876_s13, %s872_s12  ;;  %p43_p4 = scmp.eq.s32.totalorder %s935_s16, 0 }
   0xe   : > { %s951_s21 = scalar_select %p27_p1, %s880_s14, %s29_s19  }
   0xf   : > { %p38_p5 = por %p37_p2, %p36_p0  ;;  %p953_p6 = por %p43_p4, %p42_p3 }
  0x10   : > { %p118_p7 = scmp.eq.s32.totalorder %s935_s16, 1  ;;  %p124_p8 = scmp.eq.s32.totalorder %s574_s17, 1 }
  0x11   : > { %s1195_s22 = scalar_select %p953_p6, 1, 0 }
  0x12   : > { %p686_p10 = scmp.lt.s32.totalorder %s884_s15, 2  ;;  %p960_p11 = por %p118_p7, %p36_p0 }
  0x13   : > { %p964_p12 = por %p124_p8, %p42_p3  ;;  %s969_s25 = sand.u32 1, %s880_s14  }
  0x14   : > { %s1196_s23 = scalar_select %p960_p11, 1, 0 }
  0x15   : > { %s1197_s24 = scalar_select %p964_p12, 1, 0 }
  0x16   : > { %s600_s26 = sshll.u32 %s884_s15, 8  ;;  %s577_s27 = sshll.u32 %s969_s25, 4 }
  0x17   : > { %p973_p13 = pnand %p686_p10, %p38_p5  ;;  %s165_s29 = sand.u32 1, %s884_s15  }
  0x18   : > { %s983_s5 = scalar_lea.hbm %s1185_s1, %s600_s26  ;;  %s169_s6 = scalar_lea.vmem [#allocation5], %s577_s27 }
  0x19   : > { %s176_s7 = sshll.u32 %s169_s6, 4  ;;  %s990_s8 = scalar_lea.sflag [#allocation6], %s165_s29  ;;  %s987_s7 = int_to_ptr.vmem [resolvable:$true] %s176_s7 }
  0x1a   : > { %s724_s9 = scalar_lea.hbm %s983_s5, 256  ;;  %p996_p2 = pneg %p973_p13 }
  0x1b   : > { %p725_p1 = scmp.ne.s32.totalorder %s983_s5, %s724_s9  ;;  %s729_s19 = scalar_lea.hbm %s1185_s1, 512 }
  0x1c   : > { %p730_p5 = scmp.lt.u32.totalorder %s983_s5, %s1185_s1  ;;  %p731_p7 = scmp.lt.u32.totalorder %s729_s19, %s724_s9 }
  0x1d   : > { %p727_p3 = pnand %p996_p2, %p725_p1  ;;  %p733_p10 = scmp.lt.u32.totalorder %s724_s9, %s983_s5 }
  0x1e   : > { %p732_p8 = por %p731_p7, %p730_p5 }
  0x1f   : > { %p728_p4 = pneg %p727_p3 }
  0x20   : > { %p734_p9 = por %p733_p10, %p732_p8 }
  0x22   : > { %p735_p0 = pnand %p734_p9, %p728_p4 }
  0x24   : > { %738 = shalt.err (!%p735_p0)
}
  0x25   : > { %s739_s29 = scalar_lea.vmem %s987_s7, 256  ;;  %s886_s4 = smov [#allocation5]  }
  0x26   : > { %p740_p1 = scmp.ne.s32.totalorder %s987_s7, %s739_s29  ;;  %s744_s6 = sshll.u32 %s886_s4, 4  ;;  %s745_s6 = int_to_ptr.vmem [resolvable:$false] %s744_s6 }
  0x27   : > { %s746_s11 = scalar_lea.vmem %s745_s6, 512  ;;  %p747_p11 = scmp.lt.s32.totalorder %s987_s7, %s745_s6 }
  0x28   : > { %p742_p3 = pnand %p740_p1, %p996_p2  ;;  %p748_p6 = scmp.lt.s32.totalorder %s746_s11, %s739_s29 }
  0x2a   : > { %p743_p12 = pneg %p742_p3  ;;  %p749_p5 = por %p748_p6, %p747_p11 }
  0x2c   : > { %p750_p7 = pnand %p749_p5, %p743_p12 }
  0x2e   : > { %753 = shalt.err (!%p750_p7)
}
  0x2f   : > { %s1190_s9 = smov 128   ;;  %s1192_s17 = smov 8  }
  0x30   : > { %678 = dma.hbm_to_vmem [thread:$0]  (!%p973_p13), %s983_s5, 256, %s987_s7, %s990_s8, %s1190_s9, %s1190_s9, %s1192_s17  }
  0x31   : > { %p205_p6 = scmp.lt.s32.totalorder %s884_s15, 3  ;;  %s1200_s0 = sld [smem:[#allocation12_spill]] }
  0x32   : > { %p1201_p9 = scmp.ge.s32.totalorder %s884_s15, 1  ;;  %s148_s4 = scalar_lea.vmem [#allocation2], %s577_s27 }
  0x33   : > { %s155_s6 = sshll.u32 %s148_s4, 4  ;;  %s583_s5 = sshll.u32 %s969_s25, 6  ;;  %s1039_s6 = int_to_ptr.vmem [resolvable:$true] %s155_s6 }
  0x34   : > { %p1033_p11 = pnand %p1201_p9, %p205_p6  ;;  %s145_s7 = scalar_lea.sflag [#allocation3], %s969_s25 }
  0x36   : > { %s1202_s29 = scalar_select %p1033_p11, 1, 0 }
  0x37   : > { %s1029_s30 = scalar_lea.hbm %s1200_s0, %s600_s26  ;;  %s759_s20 = scalar_lea.hbm %s1200_s0, 512 }
  0x38   : > { %s754_s11 = scalar_lea.hbm %s1029_s30, 256  ;;  %p760_p8 = scmp.lt.u32.totalorder %s1029_s30, %s1200_s0 }
  0x39   : > { %p755_p12 = scmp.ne.s32.totalorder %s1029_s30, %s754_s11  ;;  %p761_p10 = scmp.lt.u32.totalorder %s759_s20, %s754_s11 }
  0x3a   : > { %p763_p3 = scmp.lt.u32.totalorder %s754_s11, %s1029_s30 }
  0x3b   : > { %p757_p0 = pnand %p755_p12, %p996_p2  ;;  %p762_p1 = por %p761_p10, %p760_p8 }
  0x3d   : > { %p758_p4 = pneg %p757_p0  ;;  %p764_p5 = por %p763_p3, %p762_p1 }
  0x3f   : > { %p765_p7 = pnand %p764_p5, %p758_p4 }
  0x41   : > { %768 = shalt.err (!%p765_p7)
}
  0x42   : > { %s769_s27 = scalar_lea.vmem %s1039_s6, 256  ;;  %s889_s4 = smov [#allocation2]  }
  0x43   : > { %p770_p6 = scmp.ne.s32.totalorder %s1039_s6, %s769_s27  ;;  %s774_s26 = sshll.u32 %s889_s4, 4  ;;  %s775_s26 = int_to_ptr.vmem [resolvable:$false] %s774_s26 }
  0x44   : > { %s776_s9 = scalar_lea.vmem %s775_s26, 512  ;;  %p777_p0 = scmp.lt.s32.totalorder %s1039_s6, %s775_s26 }
  0x45   : > { %p772_p9 = pnand %p770_p6, %p996_p2  ;;  %p778_p11 = scmp.lt.s32.totalorder %s776_s9, %s769_s27 }
  0x47   : > { %p773_p12 = pneg %p772_p9  ;;  %p779_p8 = por %p778_p11, %p777_p0 }
  0x49   : > { %p780_p10 = pnand %p779_p8, %p773_p12 }
  0x4b   : > { %783 = shalt.err (!%p780_p10)
}
  0x4c   : > { %s1203_s17 = smov 8   ;;  %s1204_s11 = smov 128  }
  0x4d   : > { %675 = dma.hbm_to_vmem [thread:$0]  (!%p973_p13), %s1029_s30, 256, %s1039_s6, %s145_s7, %s1204_s11, %s1204_s11, %s1203_s17  }
  0x4e   : > { %s602_s19 = sshll.u32 %s884_s15, 10  ;;  %s190_s26 = scalar_lea.vmem [#allocation7], %s583_s5 }
  0x4f   : > { %s1073_s27 = scalar_lea.hbm %s1186_s2, %s602_s19  ;;  %s197_s9 = sshll.u32 %s190_s26, 4  ;;  %s1077_s9 = int_to_ptr.vmem [resolvable:$true] %s197_s9 }
  0x50   : > { %s784_s0 = scalar_lea.hbm %s1073_s27, 1024  ;;  %s789_s7 = scalar_lea.hbm %s1186_s2, 2048 }
  0x51   : > { %p785_p11 = scmp.ne.s32.totalorder %s1073_s27, %s784_s0  ;;  %p790_p3 = scmp.lt.u32.totalorder %s1073_s27, %s1186_s2 }
  0x52   : > { %p791_p5 = scmp.lt.u32.totalorder %s789_s7, %s784_s0  ;;  %p793_p6 = scmp.lt.u32.totalorder %s784_s0, %s1073_s27 }
  0x53   : > { %p787_p4 = pnand %p785_p11, %p996_p2 }
  0x54   : > { %p792_p7 = por %p791_p5, %p790_p3 }
  0x55   : > { %p788_p1 = pneg %p787_p4 }
  0x56   : > { %p794_p9 = por %p793_p6, %p792_p7 }
  0x58   : > { %p795_p12 = pnand %p794_p9, %p788_p1 }
  0x5a   : > { %798 = shalt.err (!%p795_p12)
}
  0x5b   : > { %s799_s25 = scalar_lea.vmem %s1077_s9, 1024  ;;  %s890_s5 = smov [#allocation7]  }
  0x5c   : > { %p800_p0 = scmp.ne.s32.totalorder %s1077_s9, %s799_s25  ;;  %s804_s4 = sshll.u32 %s890_s5, 4  ;;  %s805_s4 = int_to_ptr.vmem [resolvable:$false] %s804_s4 }
  0x5d   : > { %s806_s26 = scalar_lea.vmem %s805_s4, 2048  ;;  %p807_p11 = scmp.lt.s32.totalorder %s1077_s9, %s805_s4 }
  0x5e   : > { %p802_p8 = pnand %p800_p0, %p996_p2  ;;  %p808_p4 = scmp.lt.s32.totalorder %s806_s26, %s799_s25 }
  0x60   : > { %p803_p10 = pneg %p802_p8  ;;  %p809_p3 = por %p808_p4, %p807_p11 }
  0x62   : > { %p810_p5 = pnand %p809_p3, %p803_p10 }
  0x64   : > { %813 = shalt.err (!%p810_p5)
}
  0x65   : > { %681 = dma.hbm_to_vmem [thread:$0]  (!%p973_p13), %s1073_s27, 1024, %s1077_s9, %s990_s8, %s1204_s11, %s1204_s11, %s1203_s17  }
  0x66   : > { %p1205_p2 = scmp.ne.s32.totalorder %s1202_s29, 0 }
  0x67   : > { %s1107_s0 = sand.u32 (!%p1205_p2), 1, %s876_s13   ;;  %p1206_p1 = scmp.ne.s32.totalorder (!%p1205_p2), %s1195_s22, 0 }
  0x68   : > { %209 = sbr.rel (%p1205_p2) target bundleno = 583 (0x247), region = 32  ;;  %s1110_s10 = sshll.u32 (!%p1205_p2), %s1107_s0, 4 }
  0x69   : > { %s212_s28 = scalar_lea.sflag (!%p1205_p2), [#allocation3], %s1107_s0  ;;  %s215_s30 = scalar_lea.vmem (!%p1205_p2), [#allocation2], %s1110_s10 }
  0x6f   : > { %859 = dma.done.wait (%p1206_p1), %s212_s28, 256  }
  0x70   : > { %861 = vsyncadd (%p1206_p1), %s212_s28, 4294967040  ;;  %s220_s8 = sand.u32 1, %s935_s16   ;;  %s224_s17 = scalar_lea.vmem [#allocation5], %s1110_s10 }
  0x71   : > { %s221_s29 = scalar_lea.sflag [#allocation6], %s220_s8 }
  0x72   : > { %863 = dma.done.wait (%p1206_p1), %s221_s29, 1280  }
  0x73   : > { %865 = vsyncadd (%p1206_p1), %s221_s29, 4294966016  ;;  %s589_s11 = sshll.u32 %s1107_s0, 6  ;;  %vm276_vm0 = vcmask 523264   ;;  %v266_v8 = vld [vmem:[%s224_s17] sm:$0xff]  ;;  %v267_v13 = vld [vmem:[%s224_s17 + $0x8] sm:$0xff]  ;;  %vm360_vm1 = vcmask 130048  }
  0x74   : > { %s233_s27 = scalar_lea.vmem [#allocation7], %s589_s11  ;;  %634 = vmatprep.mubr.msk.f32.mxu0 %vm276_vm0, %v266_v8  ;;  %v358_v14 = vld [vmem:[%s215_s30] sm:$0xff]  ;;  %v359_v18 = vld [vmem:[%s215_s30 + $0x8] sm:$0xff]  ;;  %s265_s22 = scalar_lea.vmem [#allocation8], %s1110_s10 }
  0x75   : > { %v268_v0 = vld [vmem:[%s233_s27] sm:$0xff]  ;;  %v269_v1 = vld [vmem:[%s233_s27 + $0x8] sm:$0xff]  ;;  %v270_v2 = vld [vmem:[%s233_s27 + $0x10] sm:$0xff]  ;;  %641 = vmatprep.mubr.msk.f32.mxu1 %vm360_vm1, %v358_v14  ;;  %s458_s9 = sshll.u32 %s265_s22, 4  ;;  %s603_s6 = sshll.u32 %s935_s16, 8  ;;  %s1133_s9 = int_to_ptr.vmem [resolvable:$true] %s458_s9 }
  0x76   : > { %v644_v3 = vpack.c.bf16 %v269_v1, %v268_v0  ;;  %v271_v4 = vld [vmem:[%s233_s27 + $0x18] sm:$0xff]  ;;  %v272_v6 = vld [vmem:[%s233_s27 + $0x20] sm:$0xff]  ;;  %v273_v7 = vld [vmem:[%s233_s27 + $0x28] sm:$0xff]  ;;  %s1138_s20 = scalar_lea.hbm %s1187_s3, %s603_s6  ;;  %s445_s25 = scalar_lea.sflag [#allocation4], %s1107_s0 }
  0x77   : > { %v648_v5 = vpack.c.bf16 %v271_v4, %v270_v2  ;;  %v652_v9 = vpack.c.bf16 %v273_v7, %v272_v6  ;;  %v274_v10 = vld [vmem:[%s233_s27 + $0x30] sm:$0xff]  ;;  %v275_v11 = vld [vmem:[%s233_s27 + $0x38] sm:$0xff]  ;;  %s814_s5 = scalar_lea.vmem %s1133_s9, 256  ;;  %p1207_p7 = scmp.ne.s32.totalorder %s1196_s23, 0 }
  0x78   : > { %645 = vmatprep.subr.bf16.mxu0 %v644_v3  ;;  %v656_v12 = vpack.c.bf16 %v275_v11, %v274_v10  ;;  %p815_p13 = scmp.ne.s32.totalorder %s1133_s9, %s814_s5  ;;  %s891_s16 = smov [#allocation8]  }
  0x79   : > { %647 = vmatpush3.bf16.msra.mxu0 %v644_v3  ;;  %s818_s4 = sshll.u32 %s891_s16, 4  ;;  %s819_s4 = int_to_ptr.vmem [resolvable:$false] %s818_s4 }
  0x7a   : > { %649 = vmatprep.subr.bf16.mxu0 %v648_v5  ;;  %p816_p6 = pnand %p815_p13, %p1207_p7  ;;  %s820_s26 = scalar_lea.vmem %s819_s4, 512 }
  0x7b   : > { %p821_p12 = scmp.lt.s32.totalorder %s1133_s9, %s819_s4  ;;  %p822_p0 = scmp.lt.s32.totalorder %s820_s26, %s814_s5 }
  0x7c   : > { %p817_p9 = pneg %p816_p6 }
  0x7d   : > { %651 = vmatpush3.bf16.msra.mxu0 %v648_v5  ;;  %p823_p8 = por %p822_p0, %p821_p12 }
  0x7e   : > { %653 = vmatprep.subr.bf16.mxu0 %v652_v9 }
  0x7f   : > { %p824_p10 = pnand %p823_p8, %p817_p9 }
  0x81   : > { %655 = vmatpush3.bf16.msra.mxu0 %v652_v9 }
  0x82   : > { %657 = vmatprep.subr.bf16.mxu0 %v656_v12 }
  0x85   : > { %659 = vmatpush3.bf16.msra.mxu0 %v656_v12 }
  0x88   : > { %635 = vmatmul.mubr.msk.f32.vlgmr.msra.gmra.mrb[0].mxu0 %vm276_vm0, %v267_v13 }
 0x15b   : > { %v636_v15 = vpop.f32.mrb[0].mxu0 }
 0x15c   : > { %v349_v16 = vpop.f32.mrb[1].mxu0 }
 0x15d   : > { %v660_v17 = vpack.c.bf16 %v636_v15, %v349_v16 }
 0x15f   : > { %661 = vmatprep.subr.bf16.mxu1 %v660_v17 }
 0x160   : > { %663 = vmatpush3.bf16.msra.mxu1 %v660_v17 }
 0x163   : > { %642 = vmatmul.mubr.msk.f32.vlgmr.msra.gmra.mrb[0].mxu1 %vm360_vm1, %v359_v18 }
 0x236   : > { %v643_v19 = vpop.f32.mrb[0].mxu1 }
 0x237   : > { %443 = vst.msk [vmem:[%s265_s22 + $0x8] sm:$0xff] %vm276_vm0, %v643_v19  ;;  %v433_v20 = vpop.f32.mrb[1].mxu1 }
 0x238   : > { %442 = vst.msk [vmem:[%s265_s22] sm:$0xff] %vm276_vm0, %v433_v20 }
 0x239   : > { %827 = shalt.err (!%p824_p10)
}
 0x23a   : > { %s828_s10 = scalar_lea.hbm %s1138_s20, 256  ;;  %s832_s8 = scalar_lea.hbm %s1187_s3, 512 }
 0x23b   : > { %p829_p11 = scmp.ne.s32.totalorder %s1138_s20, %s828_s10  ;;  %p833_p5 = scmp.lt.u32.totalorder %s1138_s20, %s1187_s3 }
 0x23c   : > { %p834_p2 = scmp.lt.u32.totalorder %s832_s8, %s828_s10  ;;  %p836_p13 = scmp.lt.u32.totalorder %s828_s10, %s1138_s20 }
 0x23d   : > { %p830_p4 = pnand %p829_p11, %p1207_p7 }
 0x23e   : > { %p835_p1 = por %p834_p2, %p833_p5 }
 0x23f   : > { %p831_p3 = pneg %p830_p4 }
 0x240   : > { %p837_p6 = por %p836_p13, %p835_p1 }
 0x242   : > { %p838_p9 = pnand %p837_p6, %p831_p3 }
 0x244   : > { %841 = shalt.err (!%p838_p9)
}
 0x245   : > { %s892_s11 = smov 128   ;;  %s893_s27 = smov 8  }
 0x246   : > { %670 = dma.vmem_to_hbm [thread:$0]  (%p1207_p7), %s1133_s9, 256, %s1138_s20, %s445_s25, %s892_s11, %s892_s11, %s893_s27  }
 0x247 PF: > { %s473_s22 = sand.u32 1, %s872_s12   ;;  %p1208_p12 = scmp.ne.s32.totalorder %s1197_s24, 0 }
 0x248   : > { %p1209_p0 = scmp.ge.s32.totalorder %s884_s15, 2  ;;  %s474_s6 = scalar_lea.sflag [#allocation4], %s473_s22 }
 0x24a   : > { %p683_p8 = pnand %p1209_p0, %p1208_p12 }
 0x24c   : > { %867 = dma.done.wait (!%p683_p8), %s474_s6, 256  }
 0x24d   : > { %869 = vsyncadd (!%p683_p8), %s474_s6, 4294967040  ;;  %p19_p10 = scmp.ge.s32.totalorder %s939_s18, 4   ;;  %s1210_s12 = smov %s876_s13 }
 0x24e   : > { %s1211_s13 = smov %s880_s14  ;;  %s1212_s14 = smov %s951_s21 }
 0x24f   : > { %s1213_s15 = smov %s939_s18  ;;  %21 = sbr.rel (!%p19_p10) target bundleno = 9 (0x9), region = 101 }
 0x256   :  { %479 = vsyncpa [#allocation3], 1 }
 0x257   :  { %481 = vsyncpa [#allocation3 + $0x1], 1 }
 0x258   :  { %482 = vsyncpa [#allocation6], 1 }
 0x259   :  { %484 = vsyncpa [#allocation6 + $0x1], 1 }
 0x25a   :  { %485 = vsyncpa [#allocation4], 1 }
 0x25b   :  { %487 = vsyncpa [#allocation4 + $0x1], 1 }

</bundles_post_ra>
